<compile_context>
chip_gen: v5e
topology: v5e:2x2
jax: 0.10.0
libtpu: 0.0.40
codegen_flags: <defaults>
</compile_context>

<pallas_src>
import math
from functools import partial

import jax
import jax.numpy as jnp
from jax.experimental import pallas as pl
from jax.experimental.pallas import tpu as pltpu


_SMALL_LEN = 512                   # <= this: full-extent tiles + head batching
_TEMP_BUDGET_ELEMS = 512 * 1024    # f32 elems for the (Hb, tkv, tq) temporaries (~2 MiB)
_MAX_HEAD_BLOCK = 8
_NEG_INF = -1e30                   # finite "masked" value (avoids inf-inf NaNs)


# ----------------------------------------------------------------------------
# Kernel body: one (batch, head-block, q-tile, kv-tile) step of online softmax.
# ----------------------------------------------------------------------------
def _flash_attn_kernel(q_ref, k_ref, v_ref, o_ref, m_sc, l_sc, acc_sc, *,
                       scale, kv_tile, real_len, need_mask):
    """Block views (channel-major, length on the lane axis):
      q_ref: (Hb, ch, tq)   k_ref, v_ref: (Hb, ch, tkv)   o_ref: (Hb, ch, tq)
    Scratch (f32, resident across the kv grid axis):
      m_sc, l_sc: (Hb, 1, tq) running max / denom,  acc_sc: (Hb, ch, tq).
    """
    ki = pl.program_id(3)

    @pl.when(ki == 0)
    def _():
        m_sc[...] = jnp.full(m_sc.shape, _NEG_INF, dtype=m_sc.dtype)
        l_sc[...] = jnp.zeros(l_sc.shape, dtype=l_sc.dtype)
        acc_sc[...] = jnp.zeros(acc_sc.shape, dtype=acc_sc.dtype)

    # Combined q/k scale folded onto the small q tile (ch*tq elems), not the
    # (tkv, tq) score tile.
    q = q_ref[...] * scale                      # (Hb, ch, tq)
    k = k_ref[...]                              # (Hb, ch, tkv)
    v = v_ref[...]                              # (Hb, ch, tkv)

    # Scores with kv on the sublane axis, q on the lane axis:
    #   s[h, s_kv, t_q] = sum_c k[h, c, s_kv] * q[h, c, t_q]   -> (Hb, tkv, tq)
    s = jax.lax.dot_general(
        k, q,
        dimension_numbers=(((1,), (1,)), ((0,), (0,))),
        preferred_element_type=jnp.float32,
    )

    if need_mask:
        kv_pos = jax.lax.broadcasted_iota(jnp.int32, s.shape, 1) + ki * kv_tile
        valid = kv_pos < real_len
        s = jnp.where(valid, s, _NEG_INF)

    # Online softmax update (all stats are (Hb, 1, tq) -> broadcast over ch).
    m_prev = m_sc[...]
    m_new = jnp.maximum(m_prev, jnp.max(s, axis=1, keepdims=True))
    alpha = jnp.exp(m_prev - m_new)
    p = jnp.exp(s - m_new)                      # (Hb, tkv, tq) f32
    if need_mask:
        p = jnp.where(valid, p, 0.0)

    l_sc[...] = alpha * l_sc[...] + jnp.sum(p, axis=1, keepdims=True)

    #   pv[h, c, t] = sum_s v[h, c, s] * p[h, s, t]   -> (Hb, ch, tq)
    pv = jax.lax.dot_general(
        v, p.astype(v.dtype),
        dimension_numbers=(((2,), (1,)), ((0,), (0,))),
        preferred_element_type=jnp.float32,
    )
    acc_sc[...] = alpha * acc_sc[...] + pv
    m_sc[...] = m_new

    # Single, lane-dense output store per tile on the last kv step.
    @pl.when(ki == pl.num_programs(3) - 1)
    def _():
        inv_l = 1.0 / l_sc[...]                 # exact (finalize-only, negligible cost)
        o_ref[...] = (acc_sc[...] * inv_l).astype(o_ref.dtype)


# ----------------------------------------------------------------------------
# Tile planning.
# ----------------------------------------------------------------------------
def _tile_plan(length):
    """Returns (tq, tkv, padded_length, need_mask)."""
    if length <= _SMALL_LEN:
        # Full-extent blocks (exempt from the (8,128) rule); head batching below
        # amortizes the per-grid-step overhead.
        return length, length, length, False
    for tq, tkv in ((256, 512), (256, 256), (128, 128)):
        if length % tq == 0 and length % tkv == 0:
            return tq, tkv, length, False
    # Non-aligned long sequence: pad keys/queries to a 512 multiple and mask
    # the padded keys in-kernel.
    tq, tkv = 256, 512
    padded = -(-length // 512) * 512
    return tq, tkv, padded, True


def _head_block(n_heads, tq, tkv):
    """Largest divisor of n_heads keeping the (Hb, tkv, tq) f32 temporaries ~<=2 MiB."""
    cap = max(1, _TEMP_BUDGET_ELEMS // (tq * tkv))
    cap = min(cap, n_heads, _MAX_HEAD_BLOCK)
    for hb in range(cap, 0, -1):
        if n_heads % hb == 0:
            return hb
    return 1


# ----------------------------------------------------------------------------
# Wrapper: matches QKVAttention.forward.
# ----------------------------------------------------------------------------
def qkv_attention(qkv: jax.Array, n_heads: int) -> jax.Array:
    """qkv: (bs, 3*n_heads*ch, length) -> (bs, n_heads*ch, length)."""
    bs, width, length = qkv.shape
    assert width % (3 * n_heads) == 0
    ch = width // (3 * n_heads)
    scale = 1.0 / math.sqrt(ch)     # == (ch ** -0.25) ** 2, applied to q only

    tq, tkv, l_pad, need_mask = _tile_plan(length)
    hb = _head_block(n_heads, tq, tkv)

    # Free reshape: channel axis splits exactly into (3, n_heads, ch).
    x = qkv.reshape(bs, 3, n_heads, ch, length)
    if l_pad != length:
        x = jnp.pad(x, ((0, 0),) * 4 + ((0, l_pad - length),))

    grid = (bs, n_heads // hb, l_pad // tq, l_pad // tkv)

    q_spec = pl.BlockSpec((None, None, hb, ch, tq), lambda b, h, qi, ki: (b, 0, h, 0, qi))
    k_spec = pl.BlockSpec((None, None, hb, ch, tkv), lambda b, h, qi, ki: (b, 1, h, 0, ki))
    v_spec = pl.BlockSpec((None, None, hb, ch, tkv), lambda b, h, qi, ki: (b, 2, h, 0, ki))
    o_spec = pl.BlockSpec((None, hb, ch, tq), lambda b, h, qi, ki: (b, h, 0, qi))

    out = pl.pallas_call(
        partial(_flash_attn_kernel, scale=scale, kv_tile=tkv,
                real_len=length, need_mask=need_mask),
        out_shape=jax.ShapeDtypeStruct((bs, n_heads, ch, l_pad), qkv.dtype),
        grid_spec=pltpu.PrefetchScalarGridSpec(
            num_scalar_prefetch=0,
            grid=grid,
            in_specs=[q_spec, k_spec, v_spec],
            out_specs=o_spec,
            scratch_shapes=[
                pltpu.VMEM((hb, 1, tq), jnp.float32),    # running max m
                pltpu.VMEM((hb, 1, tq), jnp.float32),    # running denom l
                pltpu.VMEM((hb, ch, tq), jnp.float32),   # f32 accumulator
            ],
        ),
        compiler_params=pltpu.CompilerParams(
            dimension_semantics=("parallel", "parallel", "parallel", "arbitrary"),
            vmem_limit_bytes=32 * 1024 * 1024,
        ),
    )(x, x, x)

    if l_pad != length:
        out = out[..., :length]
    # (bs, n_heads, ch, length) -> (bs, n_heads*ch, length): free reshape.
    return out.reshape(bs, n_heads * ch, length)


# ----------------------------------------------------------------------------
# Pure-JAX reference mirroring the PyTorch forward (for the smoke test).
# ----------------------------------------------------------------------------
def _qkv_attention_ref(qkv: jax.Array, n_heads: int) -> jax.Array:
    bs, width, length = qkv.shape
    ch = width // (3 * n_heads)
    q, k, v = jnp.split(qkv, 3, axis=1)
    scale = 1.0 / math.sqrt(math.sqrt(ch))
    qh = (q * scale).reshape(bs * n_heads, ch, length)
    kh = (k * scale).reshape(bs * n_heads, ch, length)
    vh = v.reshape(bs * n_heads, ch, length)
    w = jnp.einsum("bct,bcs->bts", qh, kh)
    w = jax.nn.softmax(w.astype(jnp.float32), axis=-1).astype(w.dtype)
    a = jnp.einsum("bts,bcs->bct", w, vh)
    return a.reshape(bs, -1, length)


# TODO(synk): QKVAttention.count_flops / count_flops_attn is a host-side FLOP
# accounting hook for profilers (thop); it has no device compute to port.

# ----------------------------------------------------------------------------
# Demo / smoke test
# ----------------------------------------------------------------------------
if __name__ == "__main__":
    # Small shape (low-res feature-map attention): full-extent tiles + head batching.
    key = jax.random.PRNGKey(0)
    bs, n_heads, ch, length = 2, 2, 8, 16
    qkv = jax.random.normal(key, (bs, 3 * n_heads * ch, length), dtype=jnp.float32)

    out = jax.block_until_ready(qkv_attention(qkv, n_heads))
    ref = _qkv_attention_ref(qkv, n_heads)
    assert out.shape == ref.shape == (bs, n_heads * ch, length)
    assert out.dtype == qkv.dtype
    err = float(jnp.max(jnp.abs(out - ref)))
    assert err < 2e-3, f"small-path max abs err {err}"

    # Long, non-tile-aligned sequence: exercises the tiled online softmax,
    # kv padding + key masking, and multi-q-tile grid.
    key2 = jax.random.PRNGKey(1)
    bs2, h2, ch2, len2 = 1, 2, 16, 600          # pads to 1024, tq=256, tkv=512
    qkv2 = jax.random.normal(key2, (bs2, 3 * h2 * ch2, len2), dtype=jnp.float32)

    out2 = jax.block_until_ready(qkv_attention(qkv2, h2))
    ref2 = _qkv_attention_ref(qkv2, h2)
    assert out2.shape == ref2.shape == (bs2, h2 * ch2, len2)
    err2 = float(jnp.max(jnp.abs(out2 - ref2)))
    assert err2 < 2e-3, f"large-path max abs err {err2}"

    print("KERNEL_OK")
</pallas_src>

<mosaic_0001>
module attributes {stable_mosaic.version = 11 : i64} {
  func.func @_flash_attn_kernel(%arg0: i32, %arg1: i32, %arg2: i32, %arg3: i32, %arg4: memref<1x1x2x8x16xf32, #tpu.memory_space<vmem>>, %arg5: memref<1x1x2x8x16xf32, #tpu.memory_space<vmem>>, %arg6: memref<1x1x2x8x16xf32, #tpu.memory_space<vmem>>, %arg7: memref<1x2x8x16xf32, #tpu.memory_space<vmem>>, %arg8: memref<2x1x16xf32, #tpu.memory_space<vmem>>, %arg9: memref<2x1x16xf32, #tpu.memory_space<vmem>>, %arg10: memref<2x8x16xf32, #tpu.memory_space<vmem>>) attributes {dimension_semantics = [#tpu.dimension_semantics<parallel>, #tpu.dimension_semantics<parallel>, #tpu.dimension_semantics<parallel>, #tpu.dimension_semantics<arbitrary>], iteration_bounds = array<i64: 2, 1, 1, 1>, scalar_prefetch = 0 : i64, scratch_operands = 3 : i64, tpu.core_type = #tpu.core_type<tc>, window_params = [{transform_indices = @transform_0, window_bounds = array<i64: 1, 1, 2, 8, 16>}, {transform_indices = @transform_1, window_bounds = array<i64: 1, 1, 2, 8, 16>}, {transform_indices = @transform_2, window_bounds = array<i64: 1, 1, 2, 8, 16>}, {transform_indices = @transform_3, window_bounds = array<i64: 1, 2, 8, 16>}]} {
    %c0_i32 = arith.constant 0 : i32
    %0 = arith.cmpi eq, %arg3, %c0_i32 : i32
    %1 = arith.extui %0 : i1 to i32
    %c0_i32_0 = arith.constant 0 : i32
    %2 = arith.cmpi ne, %1, %c0_i32_0 : i32
    scf.if %2 {
      %cst_39 = arith.constant -1.000000e+30 : f32
      %37 = vector.broadcast %cst_39 : f32 to vector<2x1x16xf32>
      %c0_40 = arith.constant 0 : index
      %c0_41 = arith.constant 0 : index
      %c0_42 = arith.constant 0 : index
      %38 = vector.load %arg8[%c0_40, %c0_41, %c0_42] : memref<2x1x16xf32, #tpu.memory_space<vmem>>, vector<2x1x16xf32>
      tpu.vector_store %arg8[%c0_40, %c0_41, %c0_42], %37 {strides = array<i32>} : memref<2x1x16xf32, #tpu.memory_space<vmem>>, vector<2x1x16xf32>,
      %cst_43 = arith.constant 0.000000e+00 : f32
      %39 = vector.broadcast %cst_43 : f32 to vector<2x1x16xf32>
      %c0_44 = arith.constant 0 : index
      %c0_45 = arith.constant 0 : index
      %c0_46 = arith.constant 0 : index
      %40 = vector.load %arg9[%c0_44, %c0_45, %c0_46] : memref<2x1x16xf32, #tpu.memory_space<vmem>>, vector<2x1x16xf32>
      tpu.vector_store %arg9[%c0_44, %c0_45, %c0_46], %39 {strides = array<i32>} : memref<2x1x16xf32, #tpu.memory_space<vmem>>, vector<2x1x16xf32>,
      %cst_47 = arith.constant 0.000000e+00 : f32
      %41 = vector.broadcast %cst_47 : f32 to vector<2x8x16xf32>
      %c0_48 = arith.constant 0 : index
      %c0_49 = arith.constant 0 : index
      %c0_50 = arith.constant 0 : index
      %42 = vector.load %arg10[%c0_48, %c0_49, %c0_50] : memref<2x8x16xf32, #tpu.memory_space<vmem>>, vector<2x8x16xf32>
      tpu.vector_store %arg10[%c0_48, %c0_49, %c0_50], %41 {strides = array<i32>} : memref<2x8x16xf32, #tpu.memory_space<vmem>>, vector<2x8x16xf32>,
    } else {
    }
    %c0 = arith.constant 0 : index
    %c0_1 = arith.constant 0 : index
    %c0_2 = arith.constant 0 : index
    %c0_3 = arith.constant 0 : index
    %c0_4 = arith.constant 0 : index
    %3 = vector.load %arg4[%c0, %c0_1, %c0_2, %c0_3, %c0_4] : memref<1x1x2x8x16xf32, #tpu.memory_space<vmem>>, vector<1x1x2x8x16xf32>
    %4 = vector.shape_cast %3 : vector<1x1x2x8x16xf32> to vector<2x8x16xf32>
    %cst = arith.constant 0.353553385 : f32
    %5 = vector.broadcast %cst : f32 to vector<2x8x16xf32>
    %6 = arith.mulf %4, %5 : vector<2x8x16xf32>
    %c0_5 = arith.constant 0 : index
    %c0_6 = arith.constant 0 : index
    %c0_7 = arith.constant 0 : index
    %c0_8 = arith.constant 0 : index
    %c0_9 = arith.constant 0 : index
    %7 = vector.load %arg5[%c0_5, %c0_6, %c0_7, %c0_8, %c0_9] : memref<1x1x2x8x16xf32, #tpu.memory_space<vmem>>, vector<1x1x2x8x16xf32>
    %8 = vector.shape_cast %7 : vector<1x1x2x8x16xf32> to vector<2x8x16xf32>
    %c0_10 = arith.constant 0 : index
    %c0_11 = arith.constant 0 : index
    %c0_12 = arith.constant 0 : index
    %c0_13 = arith.constant 0 : index
    %c0_14 = arith.constant 0 : index
    %9 = vector.load %arg6[%c0_10, %c0_11, %c0_12, %c0_13, %c0_14] : memref<1x1x2x8x16xf32, #tpu.memory_space<vmem>>, vector<1x1x2x8x16xf32>
    %10 = vector.shape_cast %9 : vector<1x1x2x8x16xf32> to vector<2x8x16xf32>
    %cst_15 = arith.constant dense<0.000000e+00> : vector<2x16x16xf32>
    %11 = tpu.matmul %8, %6, %cst_15 {dimension_numbers = #tpu.dot_dimension_numbers<[1], [1], [2], [2], [0, 0, 0, 2, 1, 2], [0], [0]>} : vector<2x8x16xf32>, vector<2x8x16xf32>, vector<2x16x16xf32> -> vector<2x16x16xf32>
    %c0_16 = arith.constant 0 : index
    %c0_17 = arith.constant 0 : index
    %c0_18 = arith.constant 0 : index
    %12 = vector.load %arg8[%c0_16, %c0_17, %c0_18] : memref<2x1x16xf32, #tpu.memory_space<vmem>>, vector<2x1x16xf32>
    %cst_19 = arith.constant dense<0xFF800000> : vector<2x16xf32>
    %13 = vector.multi_reduction <maximumf>, %11, %cst_19 [1] : vector<2x16x16xf32> to vector<2x16xf32>
    %14 = vector.shape_cast %13 : vector<2x16xf32> to vector<2x1x16xf32>
    %15 = arith.maximumf %12, %14 : vector<2x1x16xf32>
    %16 = arith.subf %12, %15 : vector<2x1x16xf32>
    %17 = math.exp %16 : vector<2x1x16xf32>
    %18 = vector.broadcast %15 : vector<2x1x16xf32> to vector<2x16x16xf32>
    %19 = arith.subf %11, %18 : vector<2x16x16xf32>
    %20 = math.exp %19 : vector<2x16x16xf32>
    %c0_20 = arith.constant 0 : index
    %c0_21 = arith.constant 0 : index
    %c0_22 = arith.constant 0 : index
    %21 = vector.load %arg9[%c0_20, %c0_21, %c0_22] : memref<2x1x16xf32, #tpu.memory_space<vmem>>, vector<2x1x16xf32>
    %22 = arith.mulf %17, %21 : vector<2x1x16xf32>
    %cst_23 = arith.constant dense<0.000000e+00> : vector<2x16xf32>
    %23 = vector.multi_reduction <add>, %20, %cst_23 [1] : vector<2x16x16xf32> to vector<2x16xf32>
    %24 = vector.shape_cast %23 : vector<2x16xf32> to vector<2x1x16xf32>
    %25 = arith.addf %22, %24 : vector<2x1x16xf32>
    %c0_24 = arith.constant 0 : index
    %c0_25 = arith.constant 0 : index
    %c0_26 = arith.constant 0 : index
    %26 = vector.load %arg9[%c0_24, %c0_25, %c0_26] : memref<2x1x16xf32, #tpu.memory_space<vmem>>, vector<2x1x16xf32>
    tpu.vector_store %arg9[%c0_24, %c0_25, %c0_26], %25 {strides = array<i32>} : memref<2x1x16xf32, #tpu.memory_space<vmem>>, vector<2x1x16xf32>,
    %cst_27 = arith.constant dense<0.000000e+00> : vector<2x8x16xf32>
    %27 = tpu.matmul %10, %20, %cst_27 {dimension_numbers = #tpu.dot_dimension_numbers<[2], [1], [1], [2], [0, 0, 0, 1, 1, 2], [0], [0]>} : vector<2x8x16xf32>, vector<2x16x16xf32>, vector<2x8x16xf32> -> vector<2x8x16xf32>
    %c0_28 = arith.constant 0 : index
    %c0_29 = arith.constant 0 : index
    %c0_30 = arith.constant 0 : index
    %28 = vector.load %arg10[%c0_28, %c0_29, %c0_30] : memref<2x8x16xf32, #tpu.memory_space<vmem>>, vector<2x8x16xf32>
    %29 = vector.broadcast %17 : vector<2x1x16xf32> to vector<2x8x16xf32>
    %30 = arith.mulf %29, %28 : vector<2x8x16xf32>
    %31 = arith.addf %30, %27 : vector<2x8x16xf32>
    %c0_31 = arith.constant 0 : index
    %c0_32 = arith.constant 0 : index
    %c0_33 = arith.constant 0 : index
    %32 = vector.load %arg10[%c0_31, %c0_32, %c0_33] : memref<2x8x16xf32, #tpu.memory_space<vmem>>, vector<2x8x16xf32>
    tpu.vector_store %arg10[%c0_31, %c0_32, %c0_33], %31 {strides = array<i32>} : memref<2x8x16xf32, #tpu.memory_space<vmem>>, vector<2x8x16xf32>,
    %c0_34 = arith.constant 0 : index
    %c0_35 = arith.constant 0 : index
    %c0_36 = arith.constant 0 : index
    %33 = vector.load %arg8[%c0_34, %c0_35, %c0_36] : memref<2x1x16xf32, #tpu.memory_space<vmem>>, vector<2x1x16xf32>
    tpu.vector_store %arg8[%c0_34, %c0_35, %c0_36], %15 {strides = array<i32>} : memref<2x1x16xf32, #tpu.memory_space<vmem>>, vector<2x1x16xf32>,
    %c0_i32_37 = arith.constant 0 : i32
    %34 = arith.cmpi eq, %arg3, %c0_i32_37 : i32
    %35 = arith.extui %34 : i1 to i32
    %c0_i32_38 = arith.constant 0 : i32
    %36 = arith.cmpi ne, %35, %c0_i32_38 : i32
    scf.if %36 {
      %c0_39 = arith.constant 0 : index
      %c0_40 = arith.constant 0 : index
      %c0_41 = arith.constant 0 : index
      %37 = vector.load %arg9[%c0_39, %c0_40, %c0_41] : memref<2x1x16xf32, #tpu.memory_space<vmem>>, vector<2x1x16xf32>
      %cst_42 = arith.constant 1.000000e+00 : f32
      %38 = vector.broadcast %cst_42 : f32 to vector<2x1x16xf32>
      %39 = arith.divf %38, %37 : vector<2x1x16xf32>
      %c0_43 = arith.constant 0 : index
      %c0_44 = arith.constant 0 : index
      %c0_45 = arith.constant 0 : index
      %40 = vector.load %arg10[%c0_43, %c0_44, %c0_45] : memref<2x8x16xf32, #tpu.memory_space<vmem>>, vector<2x8x16xf32>
      %41 = vector.broadcast %39 : vector<2x1x16xf32> to vector<2x8x16xf32>
      %42 = arith.mulf %40, %41 : vector<2x8x16xf32>
      %c0_46 = arith.constant 0 : index
      %c0_47 = arith.constant 0 : index
      %c0_48 = arith.constant 0 : index
      %c0_49 = arith.constant 0 : index
      %43 = vector.load %arg7[%c0_46, %c0_47, %c0_48, %c0_49] : memref<1x2x8x16xf32, #tpu.memory_space<vmem>>, vector<1x2x8x16xf32>
      %44 = vector.shape_cast %43 : vector<1x2x8x16xf32> to vector<2x8x16xf32>
      %45 = vector.shape_cast %42 : vector<2x8x16xf32> to vector<1x2x8x16xf32>
      tpu.vector_store %arg7[%c0_46, %c0_47, %c0_48, %c0_49], %45 {strides = array<i32>} : memref<1x2x8x16xf32, #tpu.memory_space<vmem>>, vector<1x2x8x16xf32>,
    } else {
    }
    return
  }
  func.func @transform_0(%arg0: i32, %arg1: i32, %arg2: i32, %arg3: i32) -> (i32, i32, i32, i32, i32) {
    %c0_i32 = arith.constant 0 : i32
    %c0_i32_0 = arith.constant 0 : i32
    %c0_i32_1 = arith.constant 0 : i32
    return %arg0, %c0_i32, %arg1, %c0_i32_0, %arg2 : i32, i32, i32, i32, i32
  }
  func.func @transform_1(%arg0: i32, %arg1: i32, %arg2: i32, %arg3: i32) -> (i32, i32, i32, i32, i32) {
    %c1_i32 = arith.constant 1 : i32
    %c0_i32 = arith.constant 0 : i32
    %c0_i32_0 = arith.constant 0 : i32
    return %arg0, %c1_i32, %arg1, %c0_i32, %arg3 : i32, i32, i32, i32, i32
  }
  func.func @transform_2(%arg0: i32, %arg1: i32, %arg2: i32, %arg3: i32) -> (i32, i32, i32, i32, i32) {
    %c2_i32 = arith.constant 2 : i32
    %c0_i32 = arith.constant 0 : i32
    %c0_i32_0 = arith.constant 0 : i32
    return %arg0, %c2_i32, %arg1, %c0_i32, %arg3 : i32, i32, i32, i32, i32
  }
  func.func @transform_3(%arg0: i32, %arg1: i32, %arg2: i32, %arg3: i32) -> (i32, i32, i32, i32) {
    %c0_i32 = arith.constant 0 : i32
    %c0_i32_0 = arith.constant 0 : i32
    return %arg0, %arg1, %c0_i32, %arg2 : i32, i32, i32, i32
  }
}

</mosaic_0001>

<bundles_post_ra>
// kernel: tpu_custom_call.1
= control target key start
LH: loop header
LB: loop body
LE: loop exit
PB: predicated region body
PF: predicated region fallthrough
CT: control target
= control target key end

     0   :  { %s1344_s0 = inlined_call_operand.hbm [shape: f32[2,3,2,8,16], index: 0, kind: input, shape index: {}]   ;;  %s1345_s1 = inlined_call_operand.hbm [shape: f32[2,3,2,8,16], index: 1, kind: input, shape index: {}]   ;;  %s1346_s2 = inlined_call_operand.hbm [shape: f32[2,3,2,8,16], index: 2, kind: input, shape index: {}]   ;;  %s1347_s3 = inlined_call_operand.hbm [shape: f32[2,2,8,16], index: 3, kind: output, shape index: {}]  }
   0x1   :  { %1354 = sst [smem:[#allocation21_spill]] %s1345_s1 }
   0x2   :  { %8 = vsyncpa [#allocation6], 0 }
   0x3   :  { %10 = vsyncpa [#allocation6 + $0x1], 0 }
   0x4   :  { %11 = vsyncpa [#allocation9], 0 }
   0x5   :  { %13 = vsyncpa [#allocation9 + $0x1], 0 }
   0x6   :  { %14 = vsyncpa [#allocation7], 0 }
   0x7   :  { %16 = vsyncpa [#allocation7 + $0x1], 0  ;;  %s1148_s12 = smov 0   ;;  %s1150_s13 = smov 0  }
   0x8   :  { %s1152_s14 = smov 0   ;;  %s1154_s15 = smov 0  }
   0x9   :  { %s1156_s16 = smov 0   ;;  %s1158_s17 = smov 0  }
   0xa LB: > { %1355 = sst [smem:[#allocation15_spill]] %s1108_s14  ;;  %s1179_s18 = sadd.s32 4294967295, %s1120_s17   ;;  %s1120_s17 = sphi %s1158_s17, %s22_s17   ;;  %s1116_s16 = sphi %s1156_s16, %s1373_s16   ;;  %s1112_s15 = sphi %s1154_s15, %s1372_s15   ;;  %s1108_s14 = sphi %s1152_s14, %s1376_s14   ;;  %s1104_s13 = sphi %s1150_s13, %s1375_s13   ;;  %s1100_s12 = sphi %s1148_s12, %s1374_s12  }
   0xb   : > { %1356 = sst [smem:[#allocation16_spill]] %s1116_s16  ;;  %s823_s19 = sadd.s32 4294967294, %s1120_s17  }
   0xc   : > { %1357 = sst [smem:[#allocation17_spill]] %s1120_s17  ;;  %s48_s20 = sadd.s32 1, %s1116_s16 }
   0xd   : > { %s59_s21 = sadd.s32 1, %s1108_s14  ;;  %p50_p0 = scmp.ge.s32.totalorder %s48_s20, 2 }
   0xe   : > { %p66_p1 = scmp.ne.s32.totalorder %s1108_s14, %s1104_s13  ;;  %p67_p2 = scmp.eq.s32.totalorder %s1120_s17, 0 }
   0xf   : > { %p72_p3 = scmp.ne.s32.totalorder %s1104_s13, %s1100_s12  ;;  %s1378_s20 = smov (%p50_p0, %s48_s20), 0 }
  0x10   : > { %1358 = sst [smem:[#allocation18_spill]] %s1378_s20  ;;  %p1191_p4 = por %p67_p2, %p66_p1 }
  0x11   : > { %p73_p5 = scmp.eq.s32.totalorder %s1179_s18, 0  ;;  %s52_s23 = ssub.s32 %s1116_s16, %s1378_s20 }
  0x12   : > { %p160_p6 = scmp.eq.s32.totalorder %s1179_s18, 1  ;;  %p57_p7 = scmp.eq.s32.totalorder %s52_s23, 0 }
  0x13   : > { %p1199_p8 = por %p73_p5, %p72_p3  ;;  %p166_p10 = scmp.eq.s32.totalorder %s823_s19, 1 }
  0x14   : > { %p1203_p9 = por %p160_p6, %p66_p1  ;;  %p825_p12 = scmp.ge.s32.totalorder %s1120_s17, 2 }
  0x15   : > { %s1208_s26 = scalar_select %p57_p7, %s1108_s14, %s59_s21  }
  0x16   : > { %p1210_p11 = por %p166_p10, %p72_p3  ;;  %p872_p13 = scmp.lt.s32.totalorder %s1120_s17, 2 }
  0x17   : > { %1362 = sst [smem:[#allocation19_spill]] %s1208_s26  ;;  %s186_s28 = sand.u32 1, %s1108_s14  }
  0x18   : > { %s1363_s27 = scalar_select %p1210_p11, 1, 0 }
  0x19   : > { %s1217_s29 = sshll.u32 %s186_s28, 4  ;;  %s1220_s30 = smul.u32 48, %s1116_s16 }
  0x1a   : > { %1364 = sst [smem:[#allocation20_spill]] %s1363_s27  ;;  %p1224_p0 = pnand %p872_p13, %p1191_p4 }
  0x1b   : > { %s211_s5 = sand.u32 1, %s1120_s17   ;;  %s1366_s1 = sld [smem:[#allocation21_spill]] }
  0x1c   : > { %s215_s10 = scalar_lea.vmem [#allocation8], %s1217_s29  ;;  %p832_p1 = scmp.ge.s32.totalorder %s1120_s17, 1 }
  0x1d   : > { %s227_s11 = sshll.u32 %s215_s10, 4  ;;  %s212_s21 = scalar_lea.sflag [#allocation9], %s211_s5  ;;  %s228_s11 = int_to_ptr.vmem [resolvable:$true] %s227_s11 }
  0x1e   : > { %s1122_s22 = smov 128   ;;  %s1123_s23 = smov 8  }
  0x1f   : > { %p261_p2 = scmp.lt.s32.totalorder %s1120_s17, 3  ;;  %s190_s10 = scalar_lea.vmem [#allocation5], %s1217_s29 }
  0x20   : > { %s187_s5 = scalar_lea.sflag [#allocation6], %s186_s28  ;;  %s241_s26 = scalar_lea.vmem [#allocation10], %s1217_s29 }
  0x21   : > { %s721_s8 = scalar_lea.hbm %s1366_s1, %s1220_s30  ;;  %p1238_p3 = pnand %p832_p1, %p261_p2 }
  0x22   : > { %s722_s9 = scalar_lea.hbm %s721_s8, 16  ;;  %s201_s1 = sshll.u32 %s190_s10, 4  ;;  %s202_s1 = int_to_ptr.vmem [resolvable:$true] %s201_s1 }
  0x23   : > { %s225_s19 = sshll.u32 %s722_s9, 4  ;;  %s198_s9 = scalar_lea.hbm %s1344_s0, %s1220_s30  ;;  %s226_s19 = int_to_ptr.hbm [resolvable:$true] %s225_s19 }
  0x24   : > { %864 = dma.hbm_to_vmem [thread:$0]  (!%p1224_p0), %s226_s19, 256, %s228_s11, %s212_s21, %s1122_s22, %s1122_s22, %s1123_s23  }
  0x25   : > { %s199_s20 = sshll.u32 %s198_s9, 4  ;;  %s731_s19 = scalar_lea.hbm %s1346_s2, %s1220_s30  ;;  %s200_s20 = int_to_ptr.hbm [resolvable:$true] %s199_s20 }
  0x26   : > { %861 = dma.hbm_to_vmem [thread:$0]  (!%p1224_p0), %s200_s20, 256, %s202_s1, %s187_s5, %s1122_s22, %s1122_s22, %s1123_s23  }
  0x27   : > { %s253_s14 = sshll.u32 %s241_s26, 4  ;;  %s732_s17 = scalar_lea.hbm %s731_s19, 32  ;;  %s254_s14 = int_to_ptr.vmem [resolvable:$true] %s253_s14 }
  0x28   : > { %s251_s27 = sshll.u32 %s732_s17, 4  ;;  %265 = sbr.rel (%p1238_p3) target bundleno = 547 (0x223), region = 32  ;;  %s252_s27 = int_to_ptr.hbm [resolvable:$true] %s251_s27 }
  0x29   : > { %867 = dma.hbm_to_vmem [thread:$0]  (!%p1224_p0), %s252_s27, 256, %s254_s14, %s212_s21, %s1122_s22, %s1122_s22, %s1123_s23  }
  0x2a   : > { %s1259_s28 = sand.u32 (!%p1238_p3), 1, %s1104_s13  }
  0x2b   : > { %s1262_s1 = sshll.u32 (!%p1238_p3), %s1259_s28, 4  ;;  %s268_s16 = scalar_lea.sflag (!%p1238_p3), [#allocation6], %s1259_s28 }
  0x2c   : > { %s271_s20 = scalar_lea.vmem (!%p1238_p3), [#allocation5], %s1262_s1 }
  0x2d   : > { %1087 = dma.done.wait (%p1199_p8), %s268_s16, 256  }
  0x2e   : > { %1089 = vsyncadd (%p1199_p8), %s268_s16, 4294967040  ;;  %s277_s14 = sand.u32 1, %s1179_s18   ;;  %s281_s26 = scalar_lea.vmem [#allocation8], %s1262_s1 }
  0x2f   : > { %s278_s17 = scalar_lea.sflag [#allocation9], %s277_s14 }
  0x30   : > { %1091 = dma.done.wait (%p1199_p8), %s278_s17, 512  }
  0x31   : > { %1093 = vsyncadd (%p1199_p8), %s278_s17, 4294966784  ;;  %v345_v0 = vld [vmem:[%s281_s26] sm:$0xff]  ;;  %v346_v1 = vld [vmem:[%s281_s26 + $0x8] sm:$0xff]  ;;  %vm381_vm0 = vcmask 64512   ;;  %vm333_vm1 = vcmask 122880   ;;  %v1125_v11 = vmov 0.0  }
  0x32   : > { %349 = vxpose.xlu0.b32.start.end [1/1] (short) (narrow) %v345_v0, 16  ;;  %v341_v2 = vld [vmem:[%s271_s20] sm:$0xff]  ;;  %v342_v4 = vld [vmem:[%s271_s20 + $0x8] sm:$0xff]  ;;  %v1124_v10 = vmov -1e+30   ;;  %vm338_vm2 = vcmask 130048  }
  0x33   : > { %v343_v3 = vmul.f32 0.35355338, %v341_v2  ;;  %v344_v5 = vmul.f32 0.35355338, %v342_v4  ;;  %334 = vst.msk [vmem:[#allocation2] sm:$0x1] %vm333_vm1, %v1124_v10 }
  0x34   : > { %335 = vst.msk [vmem:[#allocation2 + $0x1] sm:$0x1] %vm333_vm1, %v1124_v10  ;;  %s291_s18 = scalar_lea.vmem [#allocation10], %s1262_s1  ;;  %s324_s24 = scalar_lea.vmem [#allocation11], %s1262_s1 }
  0x35   : > { %403 = vmatpush.msra.mxu0 %v343_v3  ;;  %464 = vmatpush.msra.mxu1 %v344_v5  ;;  %336 = vst.msk [vmem:[#allocation3] sm:$0x1] %vm333_vm1, %v1125_v11  ;;  %v347_v48 = vld [vmem:[%s291_s18] sm:$0xff]  ;;  %s848_s27 = sshll.u32 %s1112_s15, 4  ;;  %s671_s21 = sshll.u32 %s324_s24, 4  ;;  %s672_s21 = int_to_ptr.vmem [resolvable:$true] %s671_s21 }
  0x36   : > { %337 = vst.msk [vmem:[#allocation3 + $0x1] sm:$0x1] %vm333_vm1, %v1125_v11  ;;  %s670_s4 = scalar_lea.hbm %s1347_s3, %s848_s27  ;;  %s656_s15 = scalar_lea.sflag [#allocation7], %s1259_s28 }
  0x37   : > { %339 = vst.msk [vmem:[#allocation4] sm:$0xff] %vm338_vm2, %v1125_v11  ;;  %s673_s22 = sshll.u32 %s670_s4, 4  ;;  %s1054_s9 = scalar_lea.hbm %s1347_s3, 32  ;;  %s674_s22 = int_to_ptr.hbm [resolvable:$true] %s673_s22 }
  0x38   : > { %340 = vst.msk [vmem:[#allocation4 + $0x8] sm:$0xff] %vm338_vm2, %v1125_v11  ;;  %s1048_s23 = sshra.s32 %s674_s22, 4  ;;  %s1049_s23 = int_to_ptr.hbm [resolvable:$true] %s1048_s23 }
  0x39   : > { %s1050_s6 = scalar_lea.hbm %s1049_s23, 16  ;;  %p1055_p7 = scmp.lt.s32.totalorder %s1049_s23, %s1347_s3 }
  0x3a   : > { %v472_v23 = vld [vmem:[#allocation2] sm:$0x1]  ;;  %p1051_p4 = scmp.ne.s32.totalorder %s1049_s23, %s1050_s6  ;;  %p1056_p8 = scmp.lt.s32.totalorder %s1054_s9, %s1050_s6 }
  0x3b   : > { %v473_v41 = vld [vmem:[#allocation2 + $0x1] sm:$0x1] }
  0x3c   : > { %v519_v61 = vld [vmem:[#allocation3] sm:$0x1]  ;;  %p1052_p5 = pnand %p1051_p4, %p1203_p9  ;;  %p1057_p10 = por %p1056_p8, %p1055_p7 }
  0x3e   : > { %p1053_p6 = pneg %p1052_p5 }
  0x40   : > { %p1058_p13 = pnand %p1057_p10, %p1053_p6 }
  0x42   : > { %411 = vxpose.xlu0.b32.start.end [1/1] (short) (narrow) %v346_v1, 16 }
  0xd6   : > { %v365_v6 = vpop.trf.xlu0 }
  0xd7   : > { %837 = vmatmul.msk.f32.vlgmr.msra.gmra.mxu0 %vm381_vm0, %v365_v6 }
  0xde   : > { %v366_v7 = vpop.trf.xlu0 }
  0xdf   : > { %838 = vmatmul.msk.f32.gmra.mxu0 %vm381_vm0, %v366_v7  ;;  %v348_v7 = vld [vmem:[%s291_s18 + $0x8] sm:$0xff] }
  0xe6   : > { %v427_v8 = vpop.trf.xlu0 }
  0xe7   : > { %839 = vmatmul.msk.f32.vlgmr.msra.gmra.mxu1 %vm381_vm0, %v427_v8 }
  0xee   : > { %v428_v9 = vpop.trf.xlu0 }
  0xef   : > { %840 = vmatmul.msk.f32.gmra.mxu1 %vm381_vm0, %v428_v9 }
 0x154   : > { %v405_v12 = vpop.f32.mrf.mxu0 }
 0x155   : > { %v475_v14 = vsel %vm338_vm2, %v405_v12, -inf }
 0x15c   : > { %v408_v13 = vpop.f32.mrf.mxu0 }
 0x15d   : > { %v476_v15 = vsel %vm338_vm2, %v408_v13, -inf }
 0x15e   : > { %v477_v16 = vmax.f32 %v475_v14, %v476_v15  ;;  %v520_v15 = vld [vmem:[#allocation3 + $0x1] sm:$0x1] }
 0x160   : > { %v478_v17 = vrot.slane %v477_v16, 4 }
 0x162   : > { %v479_v18 = vmax.f32 %v477_v16, %v478_v17 }
 0x164   : > { %v480_v19 = vrot.slane %v479_v18, 2  ;;  %v466_v20 = vpop.f32.mrf.mxu1 }
 0x165   : > { %v484_v27 = vsel %vm338_vm2, %v466_v20, -inf }
 0x166   : > { %v481_v21 = vmax.f32 %v479_v18, %v480_v19 }
 0x168   : > { %v482_v22 = vrot.slane %v481_v21, 1 }
 0x16a   : > { %v483_v24 = vmax.f32 %v481_v21, %v482_v22 }
 0x16c   : > { %v493_v25 = vmax.f32 %v472_v23, %v483_v24  ;;  %v469_v26 = vpop.f32.mrf.mxu1 }
 0x16d   : > { %v485_v28 = vsel %vm338_vm2, %v469_v26, -inf }
 0x16e   : > { %v503_v29 = vperm.slane %v493_v25, 0  ;;  %606 = vst.msk [vmem:[#allocation2] sm:$0x1] %vm333_vm1, %v493_v25  ;;  %v486_v30 = vmax.f32 %v484_v27, %v485_v28  ;;  %v495_v39 = vsub.f32 %v472_v23, %v493_v25  ;;  %v592_v27 = vld [vmem:[#allocation4] sm:$0xff] }
 0x170   : > { %v507_v31 = vsub.f32 %v405_v12, %v503_v29  ;;  %v508_v32 = vsub.f32 %v408_v13, %v503_v29  ;;  %v487_v33 = vrot.slane %v486_v30, 4  ;;  %v497_v49 = vmul.f32 1.442695, %v495_v39 }
 0x172   : > { %v511_v34 = vmul.f32 1.442695, %v507_v31  ;;  %v513_v35 = vmul.f32 1.442695, %v508_v32  ;;  %v488_v36 = vmax.f32 %v486_v30, %v487_v33 }
 0x174   : > { %928 = vpow2.f32 %v511_v34  ;;  %v489_v37 = vrot.slane %v488_v36, 2 }
 0x175   : > { %930 = vpow2.f32 %v513_v35 }
 0x176   : > { %v490_v38 = vmax.f32 %v488_v36, %v489_v37  ;;  %932 = vpow2.f32 %v497_v49 }
 0x178   : > { %v491_v40 = vrot.slane %v490_v38, 1 }
 0x17a   : > { %v929_v42 = vpop.eup %928  ;;  %v492_v43 = vmax.f32 %v490_v38, %v491_v40 }
 0x17b   : > { %v931_v44 = vpop.eup %930  ;;  %v523_v45 = vsel %vm338_vm2, %v929_v42, 0.0 }
 0x17c   : > { %v524_v46 = vsel %vm338_vm2, %v931_v44, 0.0  ;;  %v494_v47 = vmax.f32 %v473_v41, %v492_v43  ;;  %563 = vmatpush.msra.mxu2 %v931_v44  ;;  %v933_v60 = vpop.eup %932 }
 0x17d   : > { %v525_v50 = vadd.f32 %v524_v46, %v523_v45  ;;  %v521_v1 = vmul.f32 %v933_v60, %v519_v61  ;;  %v596_v25 = vperm.slane %v933_v60, 0  ;;  %v593_v45 = vld [vmem:[#allocation4 + $0x8] sm:$0xff] }
 0x17e   : > { %v504_v51 = vperm.slane %v494_v47, 0  ;;  %607 = vst.msk [vmem:[#allocation2 + $0x1] sm:$0x1] %vm333_vm1, %v494_v47  ;;  %564 = vmatpush.msra.mxu2 %v929_v42  ;;  %v496_v63 = vsub.f32 %v473_v41, %v494_v47 }
 0x17f   : > { %v526_v52 = vrot.slane %v525_v50, 4  ;;  %841 = vmatmul.msk.f32.vlgmr.msra.gmra.mxu2 %vm338_vm2, %v347_v48  ;;  %v600_v28 = vmul.f32 %v596_v25, %v592_v27 }
 0x180   : > { %v509_v53 = vsub.f32 %v466_v20, %v504_v51  ;;  %v510_v54 = vsub.f32 %v469_v26, %v504_v51  ;;  %v499_v8 = vmul.f32 1.442695, %v496_v63 }
 0x181   : > { %v527_v55 = vadd.f32 %v526_v52, %v525_v50 }
 0x182   : > { %v515_v56 = vmul.f32 1.442695, %v509_v53  ;;  %v517_v57 = vmul.f32 1.442695, %v510_v54 }
 0x183   : > { %v528_v58 = vrot.slane %v527_v55, 2 }
 0x184   : > { %934 = vpow2.f32 %v515_v56 }
 0x185   : > { %v529_v59 = vadd.f32 %v528_v58, %v527_v55  ;;  %936 = vpow2.f32 %v517_v57 }
 0x186   : > { %938 = vpow2.f32 %v499_v8 }
 0x187   : > { %v530_v62 = vrot.slane %v529_v59, 1 }
 0x189   : > { %v531_v0 = vadd.f32 %v530_v62, %v529_v59 }
 0x18a   : > { %v935_v2 = vpop.eup %934 }
 0x18b   : > { %v937_v3 = vpop.eup %936  ;;  %v532_v4 = vsel %vm338_vm2, %v935_v2, 0.0  ;;  %v541_v5 = vadd.f32 %v531_v0, %v521_v1 }
 0x18c   : > { %v533_v6 = vsel %vm338_vm2, %v937_v3, 0.0  ;;  %586 = vmatpush.msra.mxu3 %v937_v3  ;;  %v939_v14 = vpop.eup %938 }
 0x18d   : > { %v534_v9 = vadd.f32 %v533_v6, %v532_v4  ;;  %544 = vst.msk [vmem:[#allocation3] sm:$0x1] %vm333_vm1, %v541_v5  ;;  %v522_v18 = vmul.f32 %v939_v14, %v520_v15  ;;  %v597_v42 = vperm.slane %v939_v14, 0 }
 0x18e   : > { %587 = vmatpush.msra.mxu3 %v935_v2 }
 0x18f   : > { %v535_v10 = vrot.slane %v534_v9, 4  ;;  %842 = vmatmul.msk.f32.vlgmr.msra.gmra.mxu3 %vm338_vm2, %v348_v7  ;;  %v601_v46 = vmul.f32 %v597_v42, %v593_v45 }
 0x191   : > { %v536_v11 = vadd.f32 %v535_v10, %v534_v9 }
 0x193   : > { %v537_v12 = vrot.slane %v536_v11, 2 }
 0x194   : > { %v611_v20 = vld [vmem:[#allocation3] sm:$0x1] }
 0x195   : > { %v538_v13 = vadd.f32 %v537_v12, %v536_v11  ;;  %940 = vrcp.f32 %v611_v20  ;;  %v624_v32 = vand.u32 2147483648, %v611_v20  ;;  %vm618_vm4 = vweird.f32 %v611_v20 }
 0x196   : > { %v622_v34 = vand.u32 2147483647, %v611_v20 }
 0x197   : > { %v539_v16 = vrot.slane %v538_v13, 1  ;;  %v625_v37 = vor.u32 1.1754944e-38, %v624_v32 }
 0x198   : > { %vm623_vm6 = vcmp.eq.f32.partialorder %v622_v34, 8.507059e+37 }
 0x199   : > { %v540_v17 = vadd.f32 %v539_v16, %v538_v13 }
 0x19b   : > { %v542_v19 = vadd.f32 %v540_v17, %v522_v18  ;;  %v941_v21 = vpop.eup %940 }
 0x19c   : > { %v614_v22 = vmul.f32 %v941_v21, %v611_v20  ;;  %vm619_vm3 = vweird.f32 %v941_v21 }
 0x19d   : > { %545 = vst.msk [vmem:[#allocation3 + $0x1] sm:$0x1] %vm333_vm1, %v542_v19  ;;  %vm620_vm5 = vmor %vm618_vm4, %vm619_vm3 }
 0x19e   : > { %v615_v24 = vsub.f32 1.0, %v614_v22 }
 0x1a0   : > { %v616_v26 = vmul.f32 %v941_v21, %v615_v24 }
 0x1a2   : > { %v617_v29 = vadd.f32 %v941_v21, %v616_v26 }
 0x1a4   : > { %v612_v23 = vld [vmem:[#allocation3 + $0x1] sm:$0x1]  ;;  %v621_v35 = vsel %vm620_vm5, %v941_v21, %v617_v29 }
 0x1a5   : > { %942 = vrcp.f32 %v612_v23  ;;  %v626_v38 = vsel %vm623_vm6, %v625_v37, %v621_v35  ;;  %v639_v49 = vand.u32 2147483648, %v612_v23  ;;  %vm633_vm8 = vweird.f32 %v612_v23 }
 0x1a6   : > { %v647_v40 = vperm.slane %v626_v38, 0  ;;  %v637_v51 = vand.u32 2147483647, %v612_v23 }
 0x1a7   : > { %v640_v53 = vor.u32 1.1754944e-38, %v639_v49 }
 0x1a8   : > { %vm638_vm10 = vcmp.eq.f32.partialorder %v637_v51, 8.507059e+37 }
 0x1ab   : > { %v943_v30 = vpop.eup %942 }
 0x1ac   : > { %v629_v36 = vmul.f32 %v943_v30, %v612_v23  ;;  %vm634_vm7 = vweird.f32 %v943_v30 }
 0x1ad   : > { %vm635_vm9 = vmor %vm633_vm8, %vm634_vm7 }
 0x1ae   : > { %v630_v39 = vsub.f32 1.0, %v629_v36 }
 0x1b0   : > { %v631_v43 = vmul.f32 %v943_v30, %v630_v39 }
 0x1b2   : > { %v632_v47 = vadd.f32 %v943_v30, %v631_v43 }
 0x1b4   : > { %v636_v52 = vsel %vm635_vm9, %v943_v30, %v632_v47 }
 0x1b5   : > { %v641_v54 = vsel %vm638_vm10, %v640_v53, %v636_v52 }
 0x1b6   : > { %v648_v55 = vperm.slane %v641_v54, 0 }
 0x202   : > { %v566_v31 = vpop.f32.mrf.mxu2 }
 0x203   : > { %v602_v33 = vadd.f32 %v600_v28, %v566_v31 }
 0x205   : > { %604 = vst.msk [vmem:[#allocation4] sm:$0xff] %vm338_vm2, %v602_v33 }
 0x20c   : > { %v643_v41 = vld [vmem:[#allocation4] sm:$0xff] }
 0x20d   : > { %v651_v44 = vmul.f32 %v647_v40, %v643_v41 }
 0x20f   : > { %653 = vst.msk [vmem:[%s324_s24] sm:$0xff] %vm338_vm2, %v651_v44 }
 0x212   : > { %v589_v48 = vpop.f32.mrf.mxu3 }
 0x213   : > { %v603_v50 = vadd.f32 %v601_v46, %v589_v48 }
 0x215   : > { %605 = vst.msk [vmem:[#allocation4 + $0x8] sm:$0xff] %vm338_vm2, %v603_v50 }
 0x21c   : > { %v644_v56 = vld [vmem:[#allocation4 + $0x8] sm:$0xff] }
 0x21d   : > { %v652_v57 = vmul.f32 %v648_v55, %v644_v56 }
 0x21f   : > { %654 = vst.msk [vmem:[%s324_s24 + $0x8] sm:$0xff] %vm338_vm2, %v652_v57 }
 0x220   : > { %1061 = shalt.err (!%p1058_p13)
}
 0x221   : > { %s1126_s11 = smov 128   ;;  %s1127_s19 = smov 8  }
 0x222   : > { %856 = dma.vmem_to_hbm [thread:$0]  (%p1203_p9), %s672_s21, 256, %s674_s22, %s656_s15, %s1126_s11, %s1126_s11, %s1127_s19  }
 0x223 PF: > { %s1369_s1 = sld [smem:[#allocation17_spill]]  ;;  %s688_s16 = sand.u32 1, %s1100_s12  }
 0x224   : > { %p869_p0 = pnand %p825_p12, %p1210_p11  ;;  %s689_s20 = scalar_lea.sflag [#allocation7], %s688_s16 }
 0x226   : > { %p870_p1 = pneg %p869_p0 }
 0x228   : > { %1095 = dma.done.wait (%p870_p1), %s689_s20, 256  }
 0x229   : > { %1097 = vsyncadd (%p870_p1), %s689_s20, 4294967040  ;;  %s22_s17 = sadd.s32 1, %s1369_s1   ;;  %s1370_s14 = sld [smem:[#allocation15_spill]] }
 0x22a   : > { %p19_p2 = scmp.ge.s32.totalorder %s22_s17, 4   ;;  %s1371_s26 = sld [smem:[#allocation19_spill]] }
 0x22b   : > { %s1372_s15 = sld [smem:[#allocation16_spill]]  ;;  %s1374_s12 = smov %s1104_s13 }
 0x22c   : > { %s1373_s16 = sld [smem:[#allocation18_spill]]  ;;  %21 = sbr.rel (!%p19_p2) target bundleno = 10 (0xa), region = 109 }
 0x22f   : > { %s1375_s13 = smov %s1370_s14 }
 0x230   : > { %s1376_s14 = smov %s1371_s26 }
 0x231   :  { %695 = vsyncpa [#allocation6], 1 }
 0x232   :  { %697 = vsyncpa [#allocation6 + $0x1], 1 }
 0x233   :  { %698 = vsyncpa [#allocation9], 1 }
 0x234   :  { %700 = vsyncpa [#allocation9 + $0x1], 1 }
 0x235   :  { %701 = vsyncpa [#allocation7], 1 }
 0x236   :  { %703 = vsyncpa [#allocation7 + $0x1], 1 }

</bundles_post_ra>
